<compile_context>
chip_gen: v7x
topology: tpu7x:2x2x1
jax: 0.10.0
libtpu: 0.0.40
codegen_flags: <defaults>
</compile_context>

<pallas_src>
import jax
import jax.numpy as jnp
from jax.experimental import pallas as pl
from jax.experimental.pallas import tpu as pltpu

SMOOTH = 1e-5


def _bce_dice_kernel(pred_ref, label_ref, bce_out_ref, dice_out_ref,
                     bce_acc, inter_acc, p_acc, t_acc):
    # pred_ref / label_ref: (r_tile, 128) tile of one (channel, sample).
    t_idx = pl.program_id(2)
    n_tiles = pl.num_programs(2)

    @pl.when(t_idx == 0)
    def _():
        bce_acc[...] = jnp.zeros_like(bce_acc)
        inter_acc[...] = jnp.zeros_like(inter_acc)
        p_acc[...] = jnp.zeros_like(p_acc)
        t_acc[...] = jnp.zeros_like(t_acc)

    x = pred_ref[...].astype(jnp.float32)
    y = label_ref[...].astype(jnp.float32)

    # One shared exp(-|x|) feeds both the stable BCE term and the sigmoid.
    e = jnp.exp(-jnp.abs(x))
    bce_elem = jnp.maximum(x, 0.0) - x * y + jnp.log1p(e)
    r = 1.0 / (1.0 + e)
    sig = jnp.where(x >= 0.0, r, e * r)

    # Lane-wise partial sums (sublane reduction only) into VMEM scratch.
    bce_acc[...] += jnp.sum(bce_elem, axis=0, keepdims=True)
    inter_acc[...] += jnp.sum(sig * y, axis=0, keepdims=True)
    p_acc[...] += jnp.sum(sig, axis=0, keepdims=True)
    t_acc[...] += jnp.sum(y, axis=0, keepdims=True)

    @pl.when(t_idx == n_tiles - 1)
    def _():
        bce_sum = jnp.sum(bce_acc[...])
        inter = jnp.sum(inter_acc[...])
        psum = jnp.sum(p_acc[...])
        tsum = jnp.sum(t_acc[...])
        dice = (2.0 * inter + SMOOTH) / (psum + tsum + SMOOTH)
        # Lane-dense (1,128) stores; scalar extracted in the wrapper.
        bce_out_ref[...] = jnp.full((1, 128), bce_sum, dtype=jnp.float32)
        dice_out_ref[...] = jnp.full((1, 128), dice, dtype=jnp.float32)


def _pick_row_tile(rows, cap=1024):
    """Largest tile <= cap that divides `rows` and is 8-aligned (or == rows)."""
    if rows <= cap:
        return rows
    for t in range(cap, 0, -1):
        if rows % t == 0 and t % 8 == 0:
            return t
    return rows  # fallback: whole row extent in one tile


def adaptive_scale_loss(pred, label):
    """pred, label: (N, 3, H, W). Returns scalar loss matching AdaptiveScaleLoss."""
    N, C, H, W = pred.shape
    assert C == 3
    HW = H * W
    assert HW % 128 == 0, "H*W must be a multiple of 128 for lane-dense tiling"
    R = HW // 128
    r_tile = _pick_row_tile(R)
    T = R // r_tile

    # Contiguous reshape (no transpose, no extra HBM traffic).
    pred_r = pred.reshape(N, C, R, 128)
    label_r = label.reshape(N, C, R, 128)

    in_spec = pl.BlockSpec((None, None, r_tile, 128),
                           lambda c, n, t: (n, c, t, 0))
    out_spec = pl.BlockSpec((None, None, 1, 128),
                            lambda c, n, t: (c, n, 0, 0))

    bce_out, dice_out = pl.pallas_call(
        _bce_dice_kernel,
        out_shape=(
            jax.ShapeDtypeStruct((C, N, 1, 128), jnp.float32),
            jax.ShapeDtypeStruct((C, N, 1, 128), jnp.float32),
        ),
        grid_spec=pltpu.PrefetchScalarGridSpec(
            num_scalar_prefetch=0,
            grid=(C, N, T),
            in_specs=[in_spec, in_spec],
            out_specs=(out_spec, out_spec),
            scratch_shapes=[pltpu.VMEM((1, 128), jnp.float32)] * 4,
        ),
        compiler_params=pltpu.CompilerParams(
            dimension_semantics=("parallel", "parallel", "arbitrary"),
        ),
    )(pred_r, label_r)

    bce_sums = bce_out[:, :, 0, 0]   # (C, N): per-(channel, sample) BCE sums
    dice = dice_out[:, :, 0, 0]      # (C, N): per-(channel, sample) dice ratios

    bce_per_c = 0.5 * jnp.sum(bce_sums, axis=1) / (N * HW)
    dice_per_c = 1.0 - jnp.sum(dice, axis=1) / N
    return jnp.sum(bce_per_c + dice_per_c)


def _reference(pred, label):
    """Pure-JAX reference mirroring the PyTorch module."""
    def bce_dice(x, t):
        bce = jnp.mean(jnp.maximum(x, 0.0) - x * t + jnp.log1p(jnp.exp(-jnp.abs(x))))
        sig = jax.nn.sigmoid(x)
        n = x.shape[0]
        sig_f = sig.reshape(n, -1)
        t_f = t.reshape(n, -1)
        inter = jnp.sum(sig_f * t_f, axis=1)
        dice = (2.0 * inter + SMOOTH) / (jnp.sum(sig_f, axis=1) + jnp.sum(t_f, axis=1) + SMOOTH)
        dice = 1.0 - jnp.sum(dice) / n
        return 0.5 * bce + dice

    total = 0.0
    for c in range(3):
        total = total + bce_dice(pred[:, c:c + 1], label[:, c:c + 1])
    return total


if __name__ == "__main__":
    key = jax.random.PRNGKey(0)
    k1, k2 = jax.random.split(key)
    N, C, H, W = 2, 3, 16, 16
    pred = jax.random.normal(k1, (N, C, H, W), dtype=jnp.float32)
    label = (jax.random.uniform(k2, (N, C, H, W)) > 0.5).astype(jnp.float32)

    loss = adaptive_scale_loss(pred, label)
    jax.block_until_ready(loss)

    ref = _reference(pred, label)
    assert jnp.allclose(loss, ref, atol=1e-5, rtol=1e-5), (loss, ref)
    print("KERNEL_OK")
</pallas_src>

<mosaic_0001>
module attributes {stable_mosaic.version = 11 : i64} {
  func.func @_bce_dice_kernel(%arg0: i32, %arg1: i32, %arg2: i32, %arg3: memref<1x1x2x128xf32, #tpu.memory_space<vmem>>, %arg4: memref<1x1x2x128xf32, #tpu.memory_space<vmem>>, %arg5: memref<1x1x1x128xf32, #tpu.memory_space<vmem>>, %arg6: memref<1x1x1x128xf32, #tpu.memory_space<vmem>>, %arg7: memref<1x128xf32, #tpu.memory_space<vmem>>, %arg8: memref<1x128xf32, #tpu.memory_space<vmem>>, %arg9: memref<1x128xf32, #tpu.memory_space<vmem>>, %arg10: memref<1x128xf32, #tpu.memory_space<vmem>>) attributes {dimension_semantics = [#tpu.dimension_semantics<parallel>, #tpu.dimension_semantics<parallel>, #tpu.dimension_semantics<arbitrary>], iteration_bounds = array<i64: 3, 2, 1>, scalar_prefetch = 0 : i64, scratch_operands = 4 : i64, tpu.core_type = #tpu.core_type<tc>, window_params = [{transform_indices = @transform_0, window_bounds = array<i64: 1, 1, 2, 128>}, {transform_indices = @transform_1, window_bounds = array<i64: 1, 1, 2, 128>}, {transform_indices = @transform_2, window_bounds = array<i64: 1, 1, 1, 128>}, {transform_indices = @transform_3, window_bounds = array<i64: 1, 1, 1, 128>}]} {
    %c0_i32 = arith.constant 0 : i32
    %0 = arith.cmpi eq, %arg2, %c0_i32 : i32
    %1 = arith.extui %0 : i1 to i32
    %c0_i32_0 = arith.constant 0 : i32
    %2 = arith.cmpi ne, %1, %c0_i32_0 : i32
    scf.if %2 {
      %cst_34 = arith.constant 0.000000e+00 : f32
      %49 = vector.broadcast %cst_34 : f32 to vector<1x128xf32>
      %c0_35 = arith.constant 0 : index
      %c0_36 = arith.constant 0 : index
      %50 = vector.load %arg7[%c0_35, %c0_36] : memref<1x128xf32, #tpu.memory_space<vmem>>, vector<1x128xf32>
      tpu.vector_store %arg7[%c0_35, %c0_36], %49 {strides = array<i32>} : memref<1x128xf32, #tpu.memory_space<vmem>>, vector<1x128xf32>,
      %cst_37 = arith.constant 0.000000e+00 : f32
      %51 = vector.broadcast %cst_37 : f32 to vector<1x128xf32>
      %c0_38 = arith.constant 0 : index
      %c0_39 = arith.constant 0 : index
      %52 = vector.load %arg8[%c0_38, %c0_39] : memref<1x128xf32, #tpu.memory_space<vmem>>, vector<1x128xf32>
      tpu.vector_store %arg8[%c0_38, %c0_39], %51 {strides = array<i32>} : memref<1x128xf32, #tpu.memory_space<vmem>>, vector<1x128xf32>,
      %cst_40 = arith.constant 0.000000e+00 : f32
      %53 = vector.broadcast %cst_40 : f32 to vector<1x128xf32>
      %c0_41 = arith.constant 0 : index
      %c0_42 = arith.constant 0 : index
      %54 = vector.load %arg9[%c0_41, %c0_42] : memref<1x128xf32, #tpu.memory_space<vmem>>, vector<1x128xf32>
      tpu.vector_store %arg9[%c0_41, %c0_42], %53 {strides = array<i32>} : memref<1x128xf32, #tpu.memory_space<vmem>>, vector<1x128xf32>,
      %cst_43 = arith.constant 0.000000e+00 : f32
      %55 = vector.broadcast %cst_43 : f32 to vector<1x128xf32>
      %c0_44 = arith.constant 0 : index
      %c0_45 = arith.constant 0 : index
      %56 = vector.load %arg10[%c0_44, %c0_45] : memref<1x128xf32, #tpu.memory_space<vmem>>, vector<1x128xf32>
      tpu.vector_store %arg10[%c0_44, %c0_45], %55 {strides = array<i32>} : memref<1x128xf32, #tpu.memory_space<vmem>>, vector<1x128xf32>,
    } else {
    }
    %c0 = arith.constant 0 : index
    %c0_1 = arith.constant 0 : index
    %c0_2 = arith.constant 0 : index
    %c0_3 = arith.constant 0 : index
    %3 = vector.load %arg3[%c0, %c0_1, %c0_2, %c0_3] : memref<1x1x2x128xf32, #tpu.memory_space<vmem>>, vector<1x1x2x128xf32>
    %4 = vector.shape_cast %3 : vector<1x1x2x128xf32> to vector<2x128xf32>
    %c0_4 = arith.constant 0 : index
    %c0_5 = arith.constant 0 : index
    %c0_6 = arith.constant 0 : index
    %c0_7 = arith.constant 0 : index
    %5 = vector.load %arg4[%c0_4, %c0_5, %c0_6, %c0_7] : memref<1x1x2x128xf32, #tpu.memory_space<vmem>>, vector<1x1x2x128xf32>
    %6 = vector.shape_cast %5 : vector<1x1x2x128xf32> to vector<2x128xf32>
    %7 = math.absf %4 : vector<2x128xf32>
    %cst = arith.constant 0.000000e+00 : f32
    %8 = vector.broadcast %cst : f32 to vector<2x128xf32>
    %9 = arith.subf %8, %7 : vector<2x128xf32>
    %10 = math.exp %9 : vector<2x128xf32>
    %cst_8 = arith.constant 0.000000e+00 : f32
    %11 = vector.broadcast %cst_8 : f32 to vector<2x128xf32>
    %12 = arith.maximumf %4, %11 : vector<2x128xf32>
    %13 = arith.mulf %4, %6 : vector<2x128xf32>
    %14 = arith.subf %12, %13 : vector<2x128xf32>
    %15 = math.log1p %10 : vector<2x128xf32>
    %16 = arith.addf %14, %15 : vector<2x128xf32>
    %cst_9 = arith.constant 1.000000e+00 : f32
    %17 = vector.broadcast %cst_9 : f32 to vector<2x128xf32>
    %18 = arith.addf %17, %10 : vector<2x128xf32>
    %cst_10 = arith.constant 1.000000e+00 : f32
    %19 = vector.broadcast %cst_10 : f32 to vector<2x128xf32>
    %20 = arith.divf %19, %18 : vector<2x128xf32>
    %cst_11 = arith.constant 0.000000e+00 : f32
    %21 = vector.broadcast %cst_11 : f32 to vector<2x128xf32>
    %22 = arith.cmpf oge, %4, %21 : vector<2x128xf32>
    %23 = arith.mulf %10, %20 : vector<2x128xf32>
    %24 = arith.select %22, %20, %23 : vector<2x128xi1>, vector<2x128xf32>
    %c0_12 = arith.constant 0 : index
    %c0_13 = arith.constant 0 : index
    %25 = vector.load %arg7[%c0_12, %c0_13] : memref<1x128xf32, #tpu.memory_space<vmem>>, vector<1x128xf32>
    %cst_14 = arith.constant dense<0.000000e+00> : vector<128xf32>
    %26 = vector.multi_reduction <add>, %16, %cst_14 [0] : vector<2x128xf32> to vector<128xf32>
    %27 = vector.shape_cast %26 : vector<128xf32> to vector<1x128xf32>
    %28 = arith.addf %25, %27 : vector<1x128xf32>
    %c0_15 = arith.constant 0 : index
    %c0_16 = arith.constant 0 : index
    %29 = vector.load %arg7[%c0_15, %c0_16] : memref<1x128xf32, #tpu.memory_space<vmem>>, vector<1x128xf32>
    tpu.vector_store %arg7[%c0_15, %c0_16], %28 {strides = array<i32>} : memref<1x128xf32, #tpu.memory_space<vmem>>, vector<1x128xf32>,
    %c0_17 = arith.constant 0 : index
    %c0_18 = arith.constant 0 : index
    %30 = vector.load %arg8[%c0_17, %c0_18] : memref<1x128xf32, #tpu.memory_space<vmem>>, vector<1x128xf32>
    %31 = arith.mulf %24, %6 : vector<2x128xf32>
    %cst_19 = arith.constant dense<0.000000e+00> : vector<128xf32>
    %32 = vector.multi_reduction <add>, %31, %cst_19 [0] : vector<2x128xf32> to vector<128xf32>
    %33 = vector.shape_cast %32 : vector<128xf32> to vector<1x128xf32>
    %34 = arith.addf %30, %33 : vector<1x128xf32>
    %c0_20 = arith.constant 0 : index
    %c0_21 = arith.constant 0 : index
    %35 = vector.load %arg8[%c0_20, %c0_21] : memref<1x128xf32, #tpu.memory_space<vmem>>, vector<1x128xf32>
    tpu.vector_store %arg8[%c0_20, %c0_21], %34 {strides = array<i32>} : memref<1x128xf32, #tpu.memory_space<vmem>>, vector<1x128xf32>,
    %c0_22 = arith.constant 0 : index
    %c0_23 = arith.constant 0 : index
    %36 = vector.load %arg9[%c0_22, %c0_23] : memref<1x128xf32, #tpu.memory_space<vmem>>, vector<1x128xf32>
    %cst_24 = arith.constant dense<0.000000e+00> : vector<128xf32>
    %37 = vector.multi_reduction <add>, %24, %cst_24 [0] : vector<2x128xf32> to vector<128xf32>
    %38 = vector.shape_cast %37 : vector<128xf32> to vector<1x128xf32>
    %39 = arith.addf %36, %38 : vector<1x128xf32>
    %c0_25 = arith.constant 0 : index
    %c0_26 = arith.constant 0 : index
    %40 = vector.load %arg9[%c0_25, %c0_26] : memref<1x128xf32, #tpu.memory_space<vmem>>, vector<1x128xf32>
    tpu.vector_store %arg9[%c0_25, %c0_26], %39 {strides = array<i32>} : memref<1x128xf32, #tpu.memory_space<vmem>>, vector<1x128xf32>,
    %c0_27 = arith.constant 0 : index
    %c0_28 = arith.constant 0 : index
    %41 = vector.load %arg10[%c0_27, %c0_28] : memref<1x128xf32, #tpu.memory_space<vmem>>, vector<1x128xf32>
    %cst_29 = arith.constant dense<0.000000e+00> : vector<128xf32>
    %42 = vector.multi_reduction <add>, %6, %cst_29 [0] : vector<2x128xf32> to vector<128xf32>
    %43 = vector.shape_cast %42 : vector<128xf32> to vector<1x128xf32>
    %44 = arith.addf %41, %43 : vector<1x128xf32>
    %c0_30 = arith.constant 0 : index
    %c0_31 = arith.constant 0 : index
    %45 = vector.load %arg10[%c0_30, %c0_31] : memref<1x128xf32, #tpu.memory_space<vmem>>, vector<1x128xf32>
    tpu.vector_store %arg10[%c0_30, %c0_31], %44 {strides = array<i32>} : memref<1x128xf32, #tpu.memory_space<vmem>>, vector<1x128xf32>,
    %c0_i32_32 = arith.constant 0 : i32
    %46 = arith.cmpi eq, %arg2, %c0_i32_32 : i32
    %47 = arith.extui %46 : i1 to i32
    %c0_i32_33 = arith.constant 0 : i32
    %48 = arith.cmpi ne, %47, %c0_i32_33 : i32
    scf.if %48 {
      %c0_34 = arith.constant 0 : index
      %c0_35 = arith.constant 0 : index
      %49 = vector.load %arg7[%c0_34, %c0_35] : memref<1x128xf32, #tpu.memory_space<vmem>>, vector<1x128xf32>
      %50 = vector.shape_cast %49 : vector<1x128xf32> to vector<1x1x128xf32>
      %cst_36 = arith.constant dense<0.000000e+00> : vector<1xf32>
      %51 = vector.multi_reduction <add>, %50, %cst_36 [1, 2] : vector<1x1x128xf32> to vector<1xf32>
      %52 = vector.shape_cast %51 : vector<1xf32> to vector<1x1x1xf32>
      %53 = vector.extract %52[0, 0, 0] : f32 from vector<1x1x1xf32>
      %c0_37 = arith.constant 0 : index
      %c0_38 = arith.constant 0 : index
      %54 = vector.load %arg8[%c0_37, %c0_38] : memref<1x128xf32, #tpu.memory_space<vmem>>, vector<1x128xf32>
      %55 = vector.shape_cast %54 : vector<1x128xf32> to vector<1x1x128xf32>
      %cst_39 = arith.constant dense<0.000000e+00> : vector<1xf32>
      %56 = vector.multi_reduction <add>, %55, %cst_39 [1, 2] : vector<1x1x128xf32> to vector<1xf32>
      %57 = vector.shape_cast %56 : vector<1xf32> to vector<1x1x1xf32>
      %58 = vector.extract %57[0, 0, 0] : f32 from vector<1x1x1xf32>
      %c0_40 = arith.constant 0 : index
      %c0_41 = arith.constant 0 : index
      %59 = vector.load %arg9[%c0_40, %c0_41] : memref<1x128xf32, #tpu.memory_space<vmem>>, vector<1x128xf32>
      %60 = vector.shape_cast %59 : vector<1x128xf32> to vector<1x1x128xf32>
      %cst_42 = arith.constant dense<0.000000e+00> : vector<1xf32>
      %61 = vector.multi_reduction <add>, %60, %cst_42 [1, 2] : vector<1x1x128xf32> to vector<1xf32>
      %62 = vector.shape_cast %61 : vector<1xf32> to vector<1x1x1xf32>
      %63 = vector.extract %62[0, 0, 0] : f32 from vector<1x1x1xf32>
      %c0_43 = arith.constant 0 : index
      %c0_44 = arith.constant 0 : index
      %64 = vector.load %arg10[%c0_43, %c0_44] : memref<1x128xf32, #tpu.memory_space<vmem>>, vector<1x128xf32>
      %65 = vector.shape_cast %64 : vector<1x128xf32> to vector<1x1x128xf32>
      %cst_45 = arith.constant dense<0.000000e+00> : vector<1xf32>
      %66 = vector.multi_reduction <add>, %65, %cst_45 [1, 2] : vector<1x1x128xf32> to vector<1xf32>
      %67 = vector.shape_cast %66 : vector<1xf32> to vector<1x1x1xf32>
      %68 = vector.extract %67[0, 0, 0] : f32 from vector<1x1x1xf32>
      %cst_46 = arith.constant 2.000000e+00 : f32
      %69 = arith.mulf %cst_46, %58 : f32
      %cst_47 = arith.constant 9.99999974E-6 : f32
      %70 = arith.addf %69, %cst_47 : f32
      %71 = arith.addf %63, %68 : f32
      %cst_48 = arith.constant 9.99999974E-6 : f32
      %72 = arith.addf %71, %cst_48 : f32
      %73 = arith.divf %70, %72 : f32
      %74 = vector.broadcast %53 : f32 to vector<1x128xf32>
      %c0_49 = arith.constant 0 : index
      %c0_50 = arith.constant 0 : index
      %c0_51 = arith.constant 0 : index
      %c0_52 = arith.constant 0 : index
      %75 = vector.load %arg5[%c0_49, %c0_50, %c0_51, %c0_52] : memref<1x1x1x128xf32, #tpu.memory_space<vmem>>, vector<1x1x1x128xf32>
      %76 = vector.shape_cast %75 : vector<1x1x1x128xf32> to vector<1x128xf32>
      %77 = vector.shape_cast %74 : vector<1x128xf32> to vector<1x1x1x128xf32>
      tpu.vector_store %arg5[%c0_49, %c0_50, %c0_51, %c0_52], %77 {strides = array<i32>} : memref<1x1x1x128xf32, #tpu.memory_space<vmem>>, vector<1x1x1x128xf32>,
      %78 = vector.broadcast %73 : f32 to vector<1x128xf32>
      %c0_53 = arith.constant 0 : index
      %c0_54 = arith.constant 0 : index
      %c0_55 = arith.constant 0 : index
      %c0_56 = arith.constant 0 : index
      %79 = vector.load %arg6[%c0_53, %c0_54, %c0_55, %c0_56] : memref<1x1x1x128xf32, #tpu.memory_space<vmem>>, vector<1x1x1x128xf32>
      %80 = vector.shape_cast %79 : vector<1x1x1x128xf32> to vector<1x128xf32>
      %81 = vector.shape_cast %78 : vector<1x128xf32> to vector<1x1x1x128xf32>
      tpu.vector_store %arg6[%c0_53, %c0_54, %c0_55, %c0_56], %81 {strides = array<i32>} : memref<1x1x1x128xf32, #tpu.memory_space<vmem>>, vector<1x1x1x128xf32>,
    } else {
    }
    return
  }
  func.func @transform_0(%arg0: i32, %arg1: i32, %arg2: i32) -> (i32, i32, i32, i32) {
    %c0_i32 = arith.constant 0 : i32
    %c0_i32_0 = arith.constant 0 : i32
    return %arg1, %arg0, %arg2, %c0_i32 : i32, i32, i32, i32
  }
  func.func @transform_1(%arg0: i32, %arg1: i32, %arg2: i32) -> (i32, i32, i32, i32) {
    %c0_i32 = arith.constant 0 : i32
    %c0_i32_0 = arith.constant 0 : i32
    return %arg1, %arg0, %arg2, %c0_i32 : i32, i32, i32, i32
  }
  func.func @transform_2(%arg0: i32, %arg1: i32, %arg2: i32) -> (i32, i32, i32, i32) {
    %c0_i32 = arith.constant 0 : i32
    %c0_i32_0 = arith.constant 0 : i32
    %c0_i32_1 = arith.constant 0 : i32
    return %arg0, %arg1, %c0_i32, %c0_i32_0 : i32, i32, i32, i32
  }
  func.func @transform_3(%arg0: i32, %arg1: i32, %arg2: i32) -> (i32, i32, i32, i32) {
    %c0_i32 = arith.constant 0 : i32
    %c0_i32_0 = arith.constant 0 : i32
    %c0_i32_1 = arith.constant 0 : i32
    return %arg0, %arg1, %c0_i32, %c0_i32_0 : i32, i32, i32, i32
  }
}

</mosaic_0001>

<bundles_post_ra>
// kernel: tpu_custom_call.1
= control target key start
LH: loop header
LB: loop body
LE: loop exit
PB: predicated region body
PF: predicated region fallthrough
CT: control target
= control target key end

     0   :  { %s1211_s0 = inlined_call_operand.hbm [shape: f32[2,3,2,128], index: 0, kind: input, shape index: {}]   ;;  %s1212_s1 = inlined_call_operand.hbm [shape: f32[2,3,2,128], index: 1, kind: input, shape index: {}]   ;;  %s1213_s2 = inlined_call_operand.hbm [shape: f32[3,2,1,128], index: 2, kind: output, shape index: {0}]   ;;  %s1214_s3 = inlined_call_operand.hbm [shape: f32[3,2,1,128], index: 3, kind: output, shape index: {1}]  }
   0x1   :  { %1219 = sst [smem:[#allocation18_spill]] %s1211_s0 }
   0x2   :  { %9 = vsyncpa [#allocation7], 0 }
   0x3   :  { %11 = vsyncpa [#allocation7 + $0x1], 0 }
   0x4   :  { %12 = vsyncpa [#allocation10], 0 }
   0x5   :  { %14 = vsyncpa [#allocation10 + $0x1], 0 }
   0x6   :  { %15 = vsyncpa [#allocation8], 0 }
   0x7   :  { %17 = vsyncpa [#allocation8 + $0x1], 0 }
   0x8   :  { %18 = vsyncpa [#allocation13], 0 }
   0x9   :  { %20 = vsyncpa [#allocation13 + $0x1], 0  ;;  %s926_s12 = smov 0   ;;  %s928_s13 = smov 0  }
   0xa   :  { %s930_s14 = smov 0   ;;  %s932_s15 = smov 0  }
   0xb   :  { %s934_s16 = smov 0   ;;  %s936_s17 = smov 0  }
   0xc   :  { %s938_s18 = smov 0   ;;  %s940_s19 = smov 0  }
   0xd LB: > { %s579_s20 = sadd.s32 4294967295, %s899_s19   ;;  %s580_s21 = sadd.s32 4294967294, %s899_s19   ;;  %s899_s19 = sphi %s940_s19, %s26_s19   ;;  %s895_s18 = sphi %s938_s18, %s1240_s18   ;;  %s891_s17 = sphi %s936_s17, %s1239_s17   ;;  %s887_s16 = sphi %s934_s16, %s1238_s16   ;;  %s883_s15 = sphi %s932_s15, %s1237_s15   ;;  %s879_s14 = sphi %s930_s14, %s1236_s14   ;;  %s875_s13 = sphi %s928_s13, %s1235_s13   ;;  %s871_s12 = sphi %s926_s12, %s1234_s12  }
   0xe   : > { %s41_s22 = sadd.s32 1, %s891_s17  ;;  %s45_s23 = sadd.s32 1, %s895_s18 }
   0xf   : > { %p43_p0 = scmp.ge.s32.totalorder %s41_s22, 2  ;;  %s56_s24 = sadd.s32 1, %s879_s14 }
  0x10   : > { %p63_p1 = scmp.ne.s32.totalorder %s879_s14, %s875_s13  ;;  %p64_p2 = scmp.eq.s32.totalorder %s899_s19, 0 }
  0x11   : > { %s1242_s22 = smov (%p43_p0, %s41_s22), 0  ;;  %s1244_s23 = smov (!%p43_p0, %s45_s23), %s895_s18 }
  0x12   : > { %s49_s25 = ssub.s32 %s891_s17, %s1242_s22  ;;  %p979_p3 = por %p64_p2, %p63_p1 }
  0x13   : > { %p47_p4 = scmp.ge.s32.totalorder %s1244_s23, 3  ;;  %p69_p5 = scmp.ne.s32.totalorder %s875_s13, %s871_s12 }
  0x14   : > { %p70_p6 = scmp.eq.s32.totalorder %s579_s20, 0  ;;  %p125_p7 = scmp.eq.s32.totalorder %s579_s20, 5 }
  0x15   : > { %s1246_s23 = smov (%p47_p4, %s1244_s23), 0  ;;  %p131_p10 = scmp.eq.s32.totalorder %s580_s21, 5 }
  0x16   : > { %p987_p8 = por %p70_p6, %p69_p5  ;;  %p991_p9 = por %p125_p7, %p63_p1 }
  0x17   : > { %s50_s29 = ssub.s32 %s895_s18, %s1246_s23  ;;  %p997_p12 = por %p131_p10, %p69_p5 }
  0x18   : > { %s1221_s27 = scalar_select %p987_p8, 1, 0 }
  0x19   : > { %s1222_s28 = scalar_select %p991_p9, 1, 0 }
  0x1a   : > { %s51_s30 = sor.u32 %s50_s29, %s49_s25  ;;  %p630_p13 = scmp.lt.s32.totalorder %s899_s19, 6 }
  0x1b   : > { %p54_p11 = scmp.eq.s32.totalorder %s51_s30, 0  ;;  %s1003_s5 = sand.u32 1, %s879_s14  }
  0x1c   : > { %s1223_s4 = scalar_select %p997_p12, 1, 0 }
  0x1d   : > { %s1006_s6 = scalar_select %p54_p11, %s879_s14, %s56_s24  }
  0x1e   : > { %s1215_s7 = sshll.u32 %s1003_s5, 1  ;;  %s596_s8 = smul.u32 3, %s891_s17 }
  0x1f   : > { %s183_s9 = scalar_lea.vmem [#allocation6], %s1215_s7  ;;  %p1014_p0 = pnand %p630_p13, %p979_p3 }
  0x20   : > { %s193_s10 = sshll.u32 %s183_s9, 4  ;;  %s1019_s20 = sadd.s32 %s895_s18, %s596_s8  ;;  %s1021_s10 = int_to_ptr.vmem [resolvable:$true] %s193_s10 }
  0x21   : > { %s1216_s21 = sshll.u32 %s1019_s20, 5  ;;  %s1225_s0 = sld [smem:[#allocation18_spill]] }
  0x22   : > { %s180_s26 = scalar_lea.sflag [#allocation7], %s1003_s5  ;;  %p707_p3 = pneg %p1014_p0 }
  0x27   : > { %s1029_s29 = scalar_lea.hbm %s1225_s0, %s1216_s21  ;;  %s710_s24 = scalar_lea.hbm %s1225_s0, 192 }
  0x28   : > { %s705_s30 = scalar_lea.hbm %s1029_s29, 32  ;;  %p711_p6 = scmp.lt.u32.totalorder %s1029_s29, %s1225_s0 }
  0x29   : > { %p706_p2 = scmp.ne.s32.totalorder %s1029_s29, %s705_s30  ;;  %p712_p7 = scmp.lt.u32.totalorder %s710_s24, %s705_s30 }
  0x2a   : > { %p714_p11 = scmp.lt.u32.totalorder %s705_s30, %s1029_s29 }
  0x2b   : > { %p708_p4 = pnand %p707_p3, %p706_p2  ;;  %p713_p10 = por %p712_p7, %p711_p6 }
  0x2d   : > { %p709_p5 = pneg %p708_p4  ;;  %p715_p13 = por %p714_p11, %p713_p10 }
  0x2f   : > { %p716_p1 = pnand %p715_p13, %p709_p5 }
  0x31   : > { %719 = shalt.err (!%p716_p1)
}
  0x32   : > { %s720_s21 = scalar_lea.vmem %s1021_s10, 32  ;;  %s901_s8 = smov [#allocation6]  }
  0x33   : > { %p721_p2 = scmp.ne.s32.totalorder %s1021_s10, %s720_s21  ;;  %s725_s9 = sshll.u32 %s901_s8, 4  ;;  %s726_s9 = int_to_ptr.vmem [resolvable:$false] %s725_s9 }
  0x34   : > { %s727_s7 = scalar_lea.vmem %s726_s9, 64  ;;  %p728_p9 = scmp.lt.s32.totalorder %s1021_s10, %s726_s9 }
  0x35   : > { %p723_p4 = pnand %p721_p2, %p707_p3  ;;  %p729_p6 = scmp.lt.s32.totalorder %s727_s7, %s720_s21 }
  0x37   : > { %p724_p12 = pneg %p723_p4  ;;  %p730_p7 = por %p729_p6, %p728_p9 }
  0x39   : > { %p731_p10 = pnand %p730_p7, %p724_p12 }
  0x3b   : > { %734 = shalt.err (!%p731_p10)
}
  0x3c   : > { %619 = dma.hbm_to_vmem [thread:$0]  (!%p1014_p0), %s1029_s29, 32, %s1021_s10, %s180_s26  }
  0x3d   : > { %p219_p1 = scmp.lt.s32.totalorder %s899_s19, 7  ;;  %s1226_s30 = sshll.u32 %s1019_s20, 5 }
  0x3e   : > { %s1064_s21 = scalar_lea.hbm %s1212_s1, %s1226_s30  ;;  %p1227_p9 = scmp.ge.s32.totalorder %s899_s19, 1 }
  0x3f   : > { %s1229_s9 = sshll.u32 %s1003_s5, 1  ;;  %s201_s10 = scalar_lea.sflag [#allocation10], %s1003_s5 }
  0x40   : > { %p1068_p12 = pnand %p1227_p9, %p219_p1  ;;  %s204_s7 = scalar_lea.vmem [#allocation9], %s1229_s9 }
  0x41   : > { %s214_s0 = sshll.u32 %s204_s7, 4  ;;  %s735_s20 = scalar_lea.hbm %s1064_s21, 32  ;;  %s215_s0 = int_to_ptr.vmem [resolvable:$true] %s214_s0 }
  0x42   : > { %s1228_s8 = scalar_select %p1068_p12, 1, 0 }
  0x43   : > { %p736_p5 = scmp.ne.s32.totalorder %s1064_s21, %s735_s20  ;;  %s740_s30 = scalar_lea.hbm %s1212_s1, 192 }
  0x44   : > { %p741_p2 = scmp.lt.u32.totalorder %s1064_s21, %s1212_s1  ;;  %p742_p4 = scmp.lt.u32.totalorder %s740_s30, %s735_s20 }
  0x45   : > { %p738_p11 = pnand %p736_p5, %p707_p3  ;;  %p744_p7 = scmp.lt.u32.totalorder %s735_s20, %s1064_s21 }
  0x46   : > { %p743_p6 = por %p742_p4, %p741_p2 }
  0x47   : > { %p739_p13 = pneg %p738_p11 }
  0x48   : > { %p745_p10 = por %p744_p7, %p743_p6 }
  0x4a   : > { %p746_p1 = pnand %p745_p10, %p739_p13 }
  0x4c   : > { %749 = shalt.err (!%p746_p1)
}
  0x4d   : > { %s750_s5 = scalar_lea.vmem %s215_s0, 32  ;;  %s902_s9 = smov [#allocation9]  }
  0x4e   : > { %p751_p9 = scmp.ne.s32.totalorder %s215_s0, %s750_s5  ;;  %s755_s7 = sshll.u32 %s902_s9, 4  ;;  %s756_s7 = int_to_ptr.vmem [resolvable:$false] %s755_s7 }
  0x4f   : > { %s757_s29 = scalar_lea.vmem %s756_s7, 64  ;;  %p758_p8 = scmp.lt.s32.totalorder %s215_s0, %s756_s7 }
  0x50   : > { %p753_p5 = pnand %p751_p9, %p707_p3  ;;  %p759_p12 = scmp.lt.s32.totalorder %s757_s29, %s750_s5 }
  0x52   : > { %p754_p11 = pneg %p753_p5  ;;  %p760_p2 = por %p759_p12, %p758_p8 }
  0x54   : > { %p761_p4 = pnand %p760_p2, %p754_p11 }
  0x56   : > { %764 = shalt.err (!%p761_p4)
}
  0x57   : > { %622 = dma.hbm_to_vmem [thread:$0]  (!%p1014_p0), %s1064_s21, 32, %s215_s0, %s201_s10  }
  0x58   : > { %p1230_p13 = scmp.ne.s32.totalorder %s1228_s8, 0 }
  0x59   : > { %s1097_s20 = sand.u32 (!%p1230_p13), 1, %s875_s13   ;;  %p1231_p3 = scmp.ne.s32.totalorder (!%p1230_p13), %s1221_s27, 0 }
  0x5a   : > { %223 = sbr.rel (%p1230_p13) target bundleno = 466 (0x1d2), region = 28  ;;  %s588_s26 = sshll.u32 (!%p1230_p13), %s1097_s20, 1 }
  0x5b   : > { %s226_s30 = scalar_lea.sflag (!%p1230_p13), [#allocation7], %s1097_s20  ;;  %s229_s24 = scalar_lea.vmem (!%p1230_p13), [#allocation6], %s588_s26 }
  0x61   : > { %854 = dma.done.wait (%p1231_p3), %s226_s30, 32  }
  0x62   : > { %856 = vsyncadd (%p1231_p3), %s226_s30, 4294967264  ;;  %s235_s0 = scalar_lea.sflag [#allocation10], %s1097_s20  ;;  %s238_s11 = scalar_lea.vmem [#allocation9], %s588_s26 }
  0x63   : > { %858 = dma.done.wait (%p1231_p3), %s235_s0, 32  }
  0x64   : > { %860 = vsyncadd (%p1231_p3), %s235_s0, 4294967264  ;;  %v903_v0 = vmov 0.0   ;;  %v277_v1 = vld [vmem:[%s229_s24] sm:$0x3]  ;;  %v278_v2 = vld [vmem:[%s238_s11] sm:$0x3] }
  0x65   : > { %275 = vst [vmem:[#allocation4] sm:$0x1] %v903_v0  ;;  %273 = vst [vmem:[#allocation2] sm:$0x1] %v903_v0  ;;  %v279_v3 = vand.u32 2147483647, %v277_v1  ;;  %v284_v20 = vmul.f32 %v278_v2, %v277_v1 }
  0x66   : > { %274 = vst [vmem:[#allocation3] sm:$0x1] %v903_v0  ;;  %276 = vst [vmem:[#allocation5] sm:$0x1] %v903_v0  ;;  %vm303_vm0 = vcmask 1041408   ;;  %v283_v19 = vmax.f32 %v277_v1, 0.0 }
  0x67   : > { %v335_v4 = vsel %vm303_vm0, %v278_v2, 0.0  ;;  %v280_v5 = vsub.f32 0.0, %v279_v3  ;;  %vm299_vm1 = vcmp.ge.f32.partialorder %v277_v1, 0.0  ;;  %vm348_vm3 = vcmask 1040384   ;;  %s590_s27 = sshll.u32 %s887_s16, 1  ;;  %s262_s10 = scalar_lea.vmem [#allocation11], %s1097_s20 }
  0x68   : > { %v336_v6 = vrot.slane %v335_v4, 4  ;;  %v285_v26 = vsub.f32 %v283_v19, %v284_v20  ;;  %s1116_s21 = sadd.s32 %s883_s15, %s590_s27  ;;  %s423_s25 = sshll.u32 %s262_s10, 4  ;;  %s1127_s25 = int_to_ptr.vmem [resolvable:$true] %s423_s25 }
  0x69   : > { %v281_v7 = vmul.f32 1.442695, %v280_v5  ;;  %s591_s8 = sshll.u32 %s1116_s21, 4  ;;  %s405_s15 = scalar_lea.sflag [#allocation8], %s1097_s20 }
  0x6a   : > { %v337_v8 = vadd.f32 %v336_v6, %v335_v4  ;;  %s1125_s7 = scalar_lea.hbm %s1213_s2, %s591_s8  ;;  %s765_s16 = scalar_lea.vmem %s1127_s25, 16 }
  0x6b   : > { %697 = vpow2.f32 %v281_v7  ;;  %p766_p8 = scmp.ne.s32.totalorder %s1127_s25, %s765_s16  ;;  %p1232_p0 = scmp.ne.s32.totalorder %s1222_s28, 0 }
  0x6c   : > { %v338_v9 = vrot.slane %v337_v8, 2  ;;  %v324_v47 = vld [vmem:[#allocation4] sm:$0x1]  ;;  %v302_v54 = vld [vmem:[#allocation2] sm:$0x1]  ;;  %s904_s26 = smov [#allocation11]  }
  0x6d   : > { %v334_v12 = vld [vmem:[#allocation5] sm:$0x1]  ;;  %v313_v52 = vld [vmem:[#allocation3] sm:$0x1]  ;;  %p767_p12 = pnand %p766_p8, %p1232_p0  ;;  %s769_s30 = sshll.u32 %s904_s26, 4  ;;  %s770_s30 = int_to_ptr.vmem [resolvable:$false] %s769_s30 }
  0x6e   : > { %v339_v10 = vadd.f32 %v338_v9, %v337_v8  ;;  %s771_s24 = scalar_lea.vmem %s770_s30, 32  ;;  %p772_p7 = scmp.lt.s32.totalorder %s1127_s25, %s770_s30 }
  0x6f   : > { %p768_p6 = pneg %p767_p12  ;;  %p773_p10 = scmp.lt.s32.totalorder %s771_s24, %s765_s16 }
  0x70   : > { %v340_v11 = vrot.slane %v339_v10, 1 }
  0x71   : > { %p774_p1 = por %p773_p10, %p772_p7 }
  0x72   : > { %v341_v13 = vadd.f32 %v340_v11, %v339_v10 }
  0x73   : > { %p775_p9 = pnand %p774_p1, %p768_p6 }
  0x74   : > { %v342_v14 = vadd.f32 %v341_v13, %v334_v12 }
  0x75   : > { %v698_v15 = vpop.eup %697 }
  0x76   : > { %343 = vst [vmem:[#allocation5] sm:$0x1] %v342_v14  ;;  %v286_v16 = vadd.f32 1.0, %v698_v15  ;;  %v289_v17 = vmul.f32 -0.5, %v698_v15  ;;  %v292_v21 = vand.u32 2147483647, %v698_v15 }
  0x78   : > { %699 = vrcp.f32 %v286_v16  ;;  %v290_v18 = vadd.f32 1.0, %v289_v17  ;;  %vm293_vm2 = vcmp.lt.f32.partialorder %v292_v21, 0.0004427343 }
  0x79   : > { %701 = vlog2.f32 %v286_v16 }
  0x7a   : > { %v291_v23 = vmul.f32 %v698_v15, %v290_v18 }
  0x7d   : > { %v381_v60 = vld [vmem:[#allocation5] sm:$0x1] }
  0x7e   : > { %v382_v63 = vsel %vm348_vm3, %v381_v60, 0.0 }
  0x82   : > { %v700_v22 = vpop.eup %699 }
  0x83   : > { %v702_v24 = vpop.eup %701  ;;  %v300_v25 = vmul.f32 %v700_v22, %v698_v15 }
  0x84   : > { %v288_v27 = vmul.f32 0.6931472, %v702_v24 }
  0x85   : > { %v301_v28 = vsel %vm299_vm1, %v700_v22, %v300_v25 }
  0x86   : > { %v314_v29 = vmul.f32 %v301_v28, %v278_v2  ;;  %v325_v30 = vsel %vm303_vm0, %v301_v28, 0.0  ;;  %v294_v31 = vsel %vm293_vm2, %v291_v23, %v288_v27 }
  0x87   : > { %v326_v32 = vrot.slane %v325_v30, 4  ;;  %v295_v33 = vadd.f32 %v294_v31, %v285_v26 }
  0x88   : > { %v315_v34 = vsel %vm303_vm0, %v314_v29, 0.0 }
  0x89   : > { %v327_v35 = vadd.f32 %v326_v32, %v325_v30  ;;  %v304_v36 = vsel %vm303_vm0, %v295_v33, 0.0  ;;  %v316_v37 = vrot.slane %v315_v34, 4 }
  0x8a   : > { %v305_v38 = vrot.slane %v304_v36, 4 }
  0x8b   : > { %v328_v39 = vrot.slane %v327_v35, 2  ;;  %v317_v40 = vadd.f32 %v316_v37, %v315_v34 }
  0x8c   : > { %v306_v41 = vadd.f32 %v305_v38, %v304_v36 }
  0x8d   : > { %v329_v42 = vadd.f32 %v328_v39, %v327_v35  ;;  %v318_v43 = vrot.slane %v317_v40, 2 }
  0x8e   : > { %v307_v44 = vrot.slane %v306_v41, 2 }
  0x8f   : > { %v330_v45 = vrot.slane %v329_v42, 1  ;;  %v319_v46 = vadd.f32 %v318_v43, %v317_v40 }
  0x90   : > { %v308_v48 = vadd.f32 %v307_v44, %v306_v41 }
  0x91   : > { %v331_v49 = vadd.f32 %v330_v45, %v329_v42  ;;  %v320_v50 = vrot.slane %v319_v46, 1 }
  0x92   : > { %v309_v51 = vrot.slane %v308_v48, 1 }
  0x93   : > { %v332_v53 = vadd.f32 %v331_v49, %v324_v47  ;;  %v321_v55 = vadd.f32 %v320_v50, %v319_v46 }
  0x94   : > { %v310_v56 = vadd.f32 %v309_v51, %v308_v48 }
  0x95   : > { %333 = vst [vmem:[#allocation4] sm:$0x1] %v332_v53  ;;  %v322_v57 = vadd.f32 %v321_v55, %v313_v52 }
  0x96   : > { %v311_v58 = vadd.f32 %v310_v56, %v302_v54 }
  0x97   : > { %323 = vst [vmem:[#allocation3] sm:$0x1] %v322_v57 }
  0x98   : > { %312 = vst [vmem:[#allocation2] sm:$0x1] %v311_v58 }
  0x9c   : > { %v370_v59 = vld [vmem:[#allocation4] sm:$0x1] }
  0x9d   : > { %v371_v61 = vsel %vm348_vm3, %v370_v59, 0.0 }
  0x9e   : > { %372 = vadd.xlane.f32.xlu1 %v371_v61  ;;  %v359_v0 = vld [vmem:[#allocation3] sm:$0x1] }
  0x9f   : > { %v347_v62 = vld [vmem:[#allocation2] sm:$0x1]  ;;  %v360_v2 = vsel %vm348_vm3, %v359_v0, 0.0 }
  0xa0   : > { %v349_v1 = vsel %vm348_vm3, %v347_v62, 0.0 }
  0xa1   : > { %350 = vadd.xlane.f32.xlu0 %v349_v1 }
  0xa2   : > { %383 = vadd.xlane.f32.xlu1 %v382_v63 }
  0xa5   : > { %361 = vadd.xlane.f32.xlu0 %v360_v2 }
 0x12b   : > { %v373_v3 = vpop.xlane.xlu1 %372 }
 0x12c   : > { %v374_v4 = vrot.slane %v373_v3, 4 }
 0x12e   : > { %v375_v5 = vadd.f32 %v374_v4, %v373_v3  ;;  %v351_v6 = vpop.xlane.xlu0 %350 }
 0x12f   : > { %v352_v7 = vrot.slane %v351_v6, 4  ;;  %v384_v8 = vpop.xlane.xlu1 %383 }
 0x130   : > { %v385_v9 = vrot.slane %v384_v8, 4  ;;  %v376_v11 = vrot.slane %v375_v5, 2 }
 0x131   : > { %v353_v10 = vadd.f32 %v352_v7, %v351_v6 }
 0x132   : > { %v386_v12 = vadd.f32 %v385_v9, %v384_v8  ;;  %v362_v13 = vpop.xlane.xlu0 %361  ;;  %v377_v19 = vadd.f32 %v376_v11, %v375_v5 }
 0x133   : > { %v354_v14 = vrot.slane %v353_v10, 2  ;;  %v363_v15 = vrot.slane %v362_v13, 4 }
 0x134   : > { %v387_v16 = vrot.slane %v386_v12, 2  ;;  %v378_v25 = vrot.slane %v377_v19, 1 }
 0x135   : > { %v364_v17 = vadd.f32 %v363_v15, %v362_v13  ;;  %v355_v18 = vadd.f32 %v354_v14, %v353_v10 }
 0x136   : > { %v388_v20 = vadd.f32 %v387_v16, %v386_v12  ;;  %v379_v29 = vadd.f32 %v378_v25, %v377_v19 }
 0x137   : > { %v365_v21 = vrot.slane %v364_v17, 2  ;;  %v356_v22 = vrot.slane %v355_v18, 1 }
 0x138   : > { %v389_v27 = vrot.slane %v388_v20, 1 }
 0x139   : > { %v366_v23 = vadd.f32 %v365_v21, %v364_v17  ;;  %v357_v24 = vadd.f32 %v356_v22, %v355_v18 }
 0x13a   : > { %v390_v30 = vadd.f32 %v389_v27, %v388_v20 }
 0x13b   : > { %598 = vpush %v357_v24  ;;  %v367_v26 = vrot.slane %v366_v23, 1 }
 0x13d   : > { %v368_v28 = vadd.f32 %v367_v26, %v366_v23 }
 0x13f   : > { %600 = vpush %v368_v28 }
 0x140   : > { %602 = vpush %v379_v29 }
 0x141   : > { %604 = vpush %v390_v30 }
 0x16c   : > { %s599_s29 = spop %598 }
 0x16d   : > { %v400_v31 = vstv %s599_s29 }
 0x16e   : > { %401 = vst [vmem:[%s262_s10] sm:$0x1] %v400_v31 }
 0x16f   : > { %778 = shalt.err (!%p775_p9)
}
 0x170   : > { %s779_s0 = scalar_lea.hbm %s1125_s7, 16  ;;  %s783_s10 = scalar_lea.hbm %s1213_s2, 96 }
 0x171   : > { %p780_p5 = scmp.ne.s32.totalorder %s1125_s7, %s779_s0  ;;  %p784_p4 = scmp.lt.u32.totalorder %s1125_s7, %s1213_s2 }
 0x172   : > { %p785_p13 = scmp.lt.u32.totalorder %s783_s10, %s779_s0  ;;  %p787_p8 = scmp.lt.u32.totalorder %s779_s0, %s1125_s7 }
 0x173   : > { %p781_p11 = pnand %p780_p5, %p1232_p0 }
 0x174   : > { %p786_p3 = por %p785_p13, %p784_p4 }
 0x175   : > { %p782_p2 = pneg %p781_p11 }
 0x176   : > { %p788_p12 = por %p787_p8, %p786_p3 }
 0x178   : > { %p789_p6 = pnand %p788_p12, %p782_p2 }
 0x17a   : > { %792 = shalt.err (!%p789_p6)
}
 0x17b   : > { %612 = dma.vmem_to_hbm [thread:$0]  (%p1232_p0), %s1127_s25, 16, %s1125_s7, %s405_s15  }
 0x17c   : > { %s601_s29 = spop %600  ;;  %s268_s27 = scalar_lea.vmem [#allocation12], %s1097_s20 }
 0x17d   : > { %s603_s16 = spop %602  ;;  %s392_s0 = smul.f32 2.0, %s601_s29 }
 0x17e   : > { %s605_s26 = spop %604  ;;  %s438_s10 = sshll.u32 %s268_s27, 4  ;;  %s1159_s10 = int_to_ptr.vmem [resolvable:$true] %s438_s10 }
 0x17f   : > { %s394_s30 = sadd.f32 %s605_s26, %s603_s16  ;;  %s1157_s15 = scalar_lea.hbm %s1214_s3, %s591_s8 }
 0x180   : > { %s393_s11 = sadd.f32 1e-05, %s392_s0  ;;  %s409_s16 = scalar_lea.sflag [#allocation13], %s1097_s20 }
 0x181   : > { %s395_s24 = sadd.f32 1e-05, %s394_s30  ;;  %s793_s29 = scalar_lea.vmem %s1159_s10, 16 }
 0x182   : > { %p794_p7 = scmp.ne.s32.totalorder %s1159_s10, %s793_s29  ;;  %s905_s26 = smov [#allocation12]  }
 0x183   : > { %v396_v32 = vstv %s395_s24  ;;  %s797_s21 = sshll.u32 %s905_s26, 4  ;;  %s798_s21 = int_to_ptr.vmem [resolvable:$false] %s797_s21 }
 0x184   : > { %703 = vrcp.f32 %v396_v32  ;;  %p795_p10 = pnand %p794_p7, %p1232_p0  ;;  %s799_s30 = scalar_lea.vmem %s798_s21, 32 }
 0x185   : > { %p800_p9 = scmp.lt.s32.totalorder %s1159_s10, %s798_s21  ;;  %p801_p5 = scmp.lt.s32.totalorder %s799_s30, %s793_s29 }
 0x186   : > { %p796_p1 = pneg %p795_p10 }
 0x187   : > { %p802_p11 = por %p801_p5, %p800_p9 }
 0x189   : > { %p803_p2 = pnand %p802_p11, %p796_p1 }
 0x18e   : > { %v704_v33 = vpop.eup %703 }
 0x18f   : > { %606 = vpush %v704_v33 }
 0x1c0   : > { %s607_s5 = spop %606 }
 0x1c1   : > { %s399_s9 = smul.f32 %s607_s5, %s393_s11 }
 0x1c3   : > { %v402_v34 = vstv %s399_s9 }
 0x1c4   : > { %403 = vst [vmem:[%s268_s27] sm:$0x1] %v402_v34 }
 0x1c5   : > { %806 = shalt.err (!%p803_p2)
}
 0x1c6   : > { %s807_s20 = scalar_lea.hbm %s1157_s15, 16  ;;  %s811_s0 = scalar_lea.hbm %s1214_s3, 96 }
 0x1c7   : > { %p808_p4 = scmp.ne.s32.totalorder %s1157_s15, %s807_s20  ;;  %p812_p8 = scmp.lt.u32.totalorder %s1157_s15, %s1214_s3 }
 0x1c8   : > { %p813_p12 = scmp.lt.u32.totalorder %s811_s0, %s807_s20  ;;  %p815_p7 = scmp.lt.u32.totalorder %s807_s20, %s1157_s15 }
 0x1c9   : > { %p809_p13 = pnand %p808_p4, %p1232_p0 }
 0x1ca   : > { %p814_p6 = por %p813_p12, %p812_p8 }
 0x1cb   : > { %p810_p3 = pneg %p809_p13 }
 0x1cc   : > { %p816_p10 = por %p815_p7, %p814_p6 }
 0x1ce   : > { %p817_p1 = pnand %p816_p10, %p810_p3 }
 0x1d0   : > { %820 = shalt.err (!%p817_p1)
}
 0x1d1   : > { %613 = dma.vmem_to_hbm [thread:$0]  (%p1232_p0), %s1159_s10, 16, %s1157_s15, %s409_s16  }
 0x1d2 PF: > { %p631_p9 = scmp.ge.s32.totalorder %s899_s19, 2  ;;  %s450_s5 = sand.u32 1, %s871_s12  }
 0x1d3   : > { %p1233_p5 = scmp.ne.s32.totalorder %s1223_s4, 0  ;;  %s451_s9 = scalar_lea.sflag [#allocation8], %s450_s5 }
 0x1d5   : > { %p624_p11 = pnand %p631_p9, %p1233_p5 }
 0x1d7   : > { %862 = dma.done.wait (!%p624_p11), %s451_s9, 16  }
 0x1d8   : > { %864 = vsyncadd (!%p624_p11), %s451_s9, 4294967280  ;;  %s459_s25 = scalar_lea.sflag [#allocation13], %s450_s5 }
 0x1d9   : > { %866 = dma.done.wait (!%p624_p11), %s459_s25, 16  }
 0x1da   : > { %868 = vsyncadd (!%p624_p11), %s459_s25, 4294967280  ;;  %s26_s19 = sadd.s32 1, %s899_s19   ;;  %s1234_s12 = smov %s875_s13 }
 0x1db   : > { %p23_p2 = scmp.ge.s32.totalorder %s26_s19, 8   ;;  %s1235_s13 = smov %s879_s14 }
 0x1dc   : > { %s1236_s14 = smov %s1006_s6  ;;  %s1237_s15 = smov %s891_s17 }
 0x1dd   : > { %s1238_s16 = smov %s895_s18  ;;  %s1239_s17 = smov %s1242_s22 }
 0x1de   : > { %s1240_s18 = smov %s1246_s23  ;;  %25 = sbr.rel (!%p23_p2) target bundleno = 13 (0xd), region = 111 }
 0x1e5   :  { %463 = vsyncpa [#allocation7], 1 }
 0x1e6   :  { %465 = vsyncpa [#allocation7 + $0x1], 1 }
 0x1e7   :  { %466 = vsyncpa [#allocation10], 1 }
 0x1e8   :  { %468 = vsyncpa [#allocation10 + $0x1], 1 }
 0x1e9   :  { %469 = vsyncpa [#allocation8], 1 }
 0x1ea   :  { %471 = vsyncpa [#allocation8 + $0x1], 1 }
 0x1eb   :  { %472 = vsyncpa [#allocation13], 1 }
 0x1ec   :  { %474 = vsyncpa [#allocation13 + $0x1], 1 }

</bundles_post_ra>
